<compile_context>
chip_gen: v6e
topology: v6e:2x2x1
jax: 0.10.0
libtpu: 0.0.40
codegen_flags: <defaults>
</compile_context>

<pallas_src>
import math

import jax
import jax.numpy as jnp
from jax.experimental import pallas as pl
from jax.experimental.pallas import tpu as pltpu


def _round_up(x, m):
    return (x + m - 1) // m * m


def _leaky_relu(x, slope=0.2):
    return jnp.where(x > 0, x, slope * x)


def _vmem_capacity_bytes():
    """Physical VMEM of the local chip; conservative 64 MiB fallback (v7x-safe)."""
    try:
        return int(pltpu.get_tpu_info().vmem_capacity_bytes)
    except Exception:
        return 64 << 20


def _mlp_head_kernel(x_ref,
                     w0_ref, b0_ref,
                     w1_ref, b1_ref,
                     w2_ref, b2_ref,
                     w3_ref, b3_ref,
                     y_ref, acc_ref):
    """Grid = (batch tiles ["parallel"], K tiles of layer 0 ["arbitrary"])."""
    k = pl.program_id(1)

    @pl.when(k == 0)
    def _init():
        acc_ref[...] = jnp.zeros_like(acc_ref)

    # Layer 0, K-tiled: bf16 x slab straight from HBM, f32 MXU accumulation.
    acc_ref[...] += jnp.dot(x_ref[...], w0_ref[...],
                            preferred_element_type=jnp.float32)

    @pl.when(k == pl.num_programs(1) - 1)
    def _finalize():
        # Bias add + LeakyReLU in f32 (v5e VPU has no bf16 elementwise path),
        # bf16 operands for the MXU on the resident layers 1-3.
        h = _leaky_relu(acc_ref[...] + b0_ref[...])
        h = _leaky_relu(jnp.dot(h.astype(jnp.bfloat16), w1_ref[...],
                                preferred_element_type=jnp.float32) + b1_ref[...])
        h = _leaky_relu(jnp.dot(h.astype(jnp.bfloat16), w2_ref[...],
                                preferred_element_type=jnp.float32) + b2_ref[...])
        y = jnp.dot(h.astype(jnp.bfloat16), w3_ref[...],
                    preferred_element_type=jnp.float32) + b3_ref[...]
        # Single lane-dense store; mu/logvar split happens in the JAX wrapper.
        y_ref[...] = y.astype(y_ref.dtype)


def init_mlp_head_params(key, in_channels, out_channels=512, n_mlp=4,
                         weight_dtype=jnp.bfloat16):
    """EqualLinear params, kernel-ready.

    EqualLinear: weight ~ N(0,1) of shape (out, in), bias = 0, forward uses
    weight * (1/sqrt(in)).  We store the already-scaled, transposed weight
    (in, out) in bf16, zero-padded so every dim (including layer-0 K) is a
    multiple of 128 (lane-dense); biases are f32 rows (1, out_padded).
    Zero-padded rows/cols stay exactly zero through LeakyReLU, so padding does
    not change the math.
    """
    hidden = in_channels // 4
    hidden_p = _round_up(hidden, 128)
    out2 = out_channels * 2
    out2_p = _round_up(out2, 128)

    # (logical_in, logical_out, padded_in, padded_out)
    layer_dims = []
    cin, cin_p = in_channels, _round_up(in_channels, 128)
    for _ in range(n_mlp - 1):
        layer_dims.append((cin, hidden, cin_p, hidden_p))
        cin, cin_p = hidden, hidden_p
    layer_dims.append((hidden, out2, hidden_p, out2_p))

    params = []
    for (din, dout, din_p, dout_p) in layer_dims:
        key, wk = jax.random.split(key)
        w = jax.random.normal(wk, (dout, din), dtype=jnp.float32)  # torch randn(out,in)
        scale = 1.0 / math.sqrt(din)
        w_scaled_t = (w * scale).T                                  # (in, out), f32
        w_pad = jnp.zeros((din_p, dout_p), dtype=jnp.float32)
        w_pad = w_pad.at[:din, :dout].set(w_scaled_t)
        b_pad = jnp.zeros((1, dout_p), dtype=jnp.float32)           # torch zeros bias
        params.append((w_pad.astype(weight_dtype), b_pad))
    return params


def mlp_head_forward(x_nchw, params, out_channels, *, max_block_b=512):
    """x_nchw: (B, C, H, W).  Returns [mu, logvar], each (B, out_channels)."""
    B = x_nchw.shape[0]
    x = x_nchw.reshape(B, -1)                     # x.view(B, -1), plain-JAX glue
    F_dim = x.shape[1]

    (w0, b0), (w1, b1), (w2, b2), (w3, b3) = params
    hidden_p = w0.shape[1]
    out2_p = w3.shape[1]

    # ---------------- generation-aware VMEM budget & tile selection ----------
    cap = _vmem_capacity_bytes()
    budget = int(cap * 0.70)

    # Layers 1-3 + biases stay resident, but Pallas double-buffers inputs.
    resident2 = 2 * sum(int(a.size) * a.dtype.itemsize
                        for a in (w1, w2, w3, b0, b1, b2, b3))

    def tile_cost(tb_, tk_):
        return (resident2
                + 2 * tk_ * hidden_p * 2       # double-buffered w0 K-slab (bf16)
                + 2 * tb_ * tk_ * 2            # double-buffered bf16 x tile
                + 2 * tb_ * out2_p * 4         # double-buffered f32 y tile
                + 4 * tb_ * hidden_p * 4)      # acc scratch + live f32 intermediates

    # Batch tile: multiple of 16 (bf16 sublane packing); keep >= 2 grid steps
    # when the batch allows it so v7x's second TensorCore gets work.
    b_pad = _round_up(max(B, 1), 16)
    tb = min(max_block_b, b_pad)
    if b_pad >= 32:
        tb = min(tb, _round_up((b_pad + 1) // 2, 16))
    tb = max(16, _round_up(tb, 16))

    F_pad = _round_up(F_dim, 128)

    def best_tk(tb_):
        tk_ = F_pad
        while tk_ > 128 and tile_cost(tb_, tk_) > budget:
            tk_ = _round_up(tk_ // 2, 128)
        return tk_

    tk = best_tk(tb)
    while tb > 16 and tile_cost(tb, tk) > budget:
        tb = max(16, _round_up(tb // 2, 16))
        tk = best_tk(tb)

    b_pad = _round_up(b_pad, tb)
    F_final = _round_up(F_pad, tk)

    # ---------------- pad + cast activations (bf16 halves HBM traffic) -------
    x = x.astype(jnp.bfloat16)
    if (b_pad, F_final) != (B, F_dim):
        x = jnp.pad(x, ((0, b_pad - B), (0, F_final - F_dim)))
    if w0.shape[0] < F_final:                    # extend layer-0 K padding if needed
        w0 = jnp.pad(w0, ((0, F_final - w0.shape[0]), (0, 0)))

    grid = (b_pad // tb, F_final // tk)

    x_spec = pl.BlockSpec((tb, tk), lambda i, k: (i, k))
    w0_spec = pl.BlockSpec((tk, hidden_p), lambda i, k: (k, 0))
    y_spec = pl.BlockSpec((tb, out2_p), lambda i, k: (i, 0))

    def resident(a):   # constant block index -> stays in VMEM across the grid
        return pl.BlockSpec(a.shape, lambda i, k: (0, 0))

    # Advisory cost estimate for XLA scheduling around the custom call.
    flops = 2 * b_pad * (F_final * hidden_p
                         + hidden_p * hidden_p * 2
                         + hidden_p * out2_p)
    weight_bytes = (int(w0.size) * w0.dtype.itemsize + int(b0.size) * b0.dtype.itemsize
                    + sum(int(w.size) * w.dtype.itemsize + int(b.size) * b.dtype.itemsize
                          for (w, b) in ((w1, b1), (w2, b2), (w3, b3))))
    bytes_accessed = int(x.size) * x.dtype.itemsize + weight_bytes + b_pad * out2_p * 4
    cost = pl.CostEstimate(flops=int(flops), transcendentals=0,
                           bytes_accessed=int(bytes_accessed))

    # VMEM limit: what we actually need + headroom, clamped below physical VMEM.
    need = tile_cost(tb, tk) + (4 << 20)
    vmem_limit = int(min(max(need, 16 << 20), int(cap * 0.90)))

    y = pl.pallas_call(
        _mlp_head_kernel,
        out_shape=jax.ShapeDtypeStruct((b_pad, out2_p), jnp.float32),
        grid=grid,
        in_specs=[x_spec,
                  w0_spec, resident(b0),
                  resident(w1), resident(b1),
                  resident(w2), resident(b2),
                  resident(w3), resident(b3)],
        out_specs=y_spec,
        scratch_shapes=[pltpu.VMEM((tb, hidden_p), jnp.float32)],
        compiler_params=pltpu.CompilerParams(
            dimension_semantics=("parallel", "arbitrary"),
            vmem_limit_bytes=vmem_limit),
        cost_estimate=cost,
    )(x, w0, b0, w1, b1, w2, b2, w3, b3)

    y = y[:B]                                   # drop batch padding
    mu = y[:, :out_channels]                    # split outside the kernel
    logvar = y[:, out_channels:2 * out_channels]
    return [mu, logvar]


def mlp_head_reference(x_nchw, params, out_channels):
    """Pure-JAX reference mirroring the kernel path (bf16 operands, f32 accum)."""
    B = x_nchw.shape[0]
    h = x_nchw.reshape(B, -1).astype(jnp.bfloat16)
    (w0, b0), *mid, (w_last, b_last) = params
    if h.shape[1] < w0.shape[0]:
        h = jnp.pad(h, ((0, 0), (0, w0.shape[0] - h.shape[1])))
    h = jnp.dot(h, w0, preferred_element_type=jnp.float32) + b0
    h = jnp.where(h > 0, h, 0.2 * h)
    for (w, b) in mid:
        h = jnp.dot(h.astype(jnp.bfloat16), w,
                    preferred_element_type=jnp.float32) + b
        h = jnp.where(h > 0, h, 0.2 * h)
    y = jnp.dot(h.astype(jnp.bfloat16), w_last,
                preferred_element_type=jnp.float32) + b_last
    return [y[:, :out_channels], y[:, out_channels:2 * out_channels]]


if __name__ == "__main__":
    # Small shapes consistent with the module: NCHW input flattened to
    # in_channels = C*H*W = 4*4*4 = 64, hidden = 16 (padded to 128),
    # out_channels = 32 (2*out padded to 128).
    B, C, H, W = 2, 4, 4, 4
    in_channels = C * H * W
    out_channels = 32

    key = jax.random.PRNGKey(0)
    key, xk = jax.random.split(key)
    x = jax.random.normal(xk, (B, C, H, W), dtype=jnp.float32)

    params = init_mlp_head_params(key, in_channels, out_channels=out_channels,
                                  n_mlp=4)

    mu, logvar = mlp_head_forward(x, params, out_channels)
    jax.block_until_ready(mu)
    jax.block_until_ready(logvar)

    mu_ref, logvar_ref = mlp_head_reference(x, params, out_channels)
    assert mu.shape == (B, out_channels) and logvar.shape == (B, out_channels)
    assert jnp.allclose(mu, mu_ref, atol=2e-3, rtol=2e-3)
    assert jnp.allclose(logvar, logvar_ref, atol=2e-3, rtol=2e-3)

    # TODO(synk): seperate=True / spatial=True branches (separate fc_mu/fc_var
    # heads and AdaptiveAvgPool2d) are not exercised by the default config.
    print("KERNEL_OK")
</pallas_src>

<mosaic_0001>
module attributes {stable_mosaic.version = 11 : i64} {
  func.func @_mlp_head_kernel(%arg0: i32, %arg1: i32, %arg2: memref<16x128xbf16, #tpu.memory_space<vmem>>, %arg3: memref<128x128xbf16, #tpu.memory_space<vmem>>, %arg4: memref<1x128xf32, #tpu.memory_space<vmem>>, %arg5: memref<128x128xbf16, #tpu.memory_space<vmem>>, %arg6: memref<1x128xf32, #tpu.memory_space<vmem>>, %arg7: memref<128x128xbf16, #tpu.memory_space<vmem>>, %arg8: memref<1x128xf32, #tpu.memory_space<vmem>>, %arg9: memref<128x128xbf16, #tpu.memory_space<vmem>>, %arg10: memref<1x128xf32, #tpu.memory_space<vmem>>, %arg11: memref<16x128xf32, #tpu.memory_space<vmem>>, %arg12: memref<16x128xf32, #tpu.memory_space<vmem>>) attributes {dimension_semantics = [#tpu.dimension_semantics<parallel>, #tpu.dimension_semantics<arbitrary>], iteration_bounds = array<i64: 1, 1>, scalar_prefetch = 0 : i64, scratch_operands = 1 : i64, tpu.core_type = #tpu.core_type<tc>, window_params = [{transform_indices = @transform_0, window_bounds = array<i64: 16, 128>}, {transform_indices = @transform_1, window_bounds = array<i64: 128, 128>}, {pipeline_mode = #tpu.pipeline_mode<synchronous>, transform_indices = @transform_2, window_bounds = array<i64: 1, 128>}, {pipeline_mode = #tpu.pipeline_mode<synchronous>, transform_indices = @transform_3, window_bounds = array<i64: 128, 128>}, {pipeline_mode = #tpu.pipeline_mode<synchronous>, transform_indices = @transform_4, window_bounds = array<i64: 1, 128>}, {pipeline_mode = #tpu.pipeline_mode<synchronous>, transform_indices = @transform_5, window_bounds = array<i64: 128, 128>}, {pipeline_mode = #tpu.pipeline_mode<synchronous>, transform_indices = @transform_6, window_bounds = array<i64: 1, 128>}, {pipeline_mode = #tpu.pipeline_mode<synchronous>, transform_indices = @transform_7, window_bounds = array<i64: 128, 128>}, {pipeline_mode = #tpu.pipeline_mode<synchronous>, transform_indices = @transform_8, window_bounds = array<i64: 1, 128>}, {transform_indices = @transform_9, window_bounds = array<i64: 16, 128>}]} {
    %c0_i32 = arith.constant 0 : i32
    %0 = arith.cmpi eq, %arg1, %c0_i32 : i32
    %1 = arith.extui %0 : i1 to i32
    %c0_i32_0 = arith.constant 0 : i32
    %2 = arith.cmpi ne, %1, %c0_i32_0 : i32
    scf.if %2 {
      %cst_10 = arith.constant 0.000000e+00 : f32
      %12 = vector.broadcast %cst_10 : f32 to vector<16x128xf32>
      %c0_11 = arith.constant 0 : index
      %c0_12 = arith.constant 0 : index
      %13 = vector.load %arg12[%c0_11, %c0_12] : memref<16x128xf32, #tpu.memory_space<vmem>>, vector<16x128xf32>
      tpu.vector_store %arg12[%c0_11, %c0_12], %12 {strides = array<i32>} : memref<16x128xf32, #tpu.memory_space<vmem>>, vector<16x128xf32>,
    } else {
    }
    %c0 = arith.constant 0 : index
    %c0_1 = arith.constant 0 : index
    %3 = vector.load %arg12[%c0, %c0_1] : memref<16x128xf32, #tpu.memory_space<vmem>>, vector<16x128xf32>
    %c0_2 = arith.constant 0 : index
    %c0_3 = arith.constant 0 : index
    %4 = vector.load %arg2[%c0_2, %c0_3] : memref<16x128xbf16, #tpu.memory_space<vmem>>, vector<16x128xbf16>
    %c0_4 = arith.constant 0 : index
    %c0_5 = arith.constant 0 : index
    %5 = vector.load %arg3[%c0_4, %c0_5] : memref<128x128xbf16, #tpu.memory_space<vmem>>, vector<128x128xbf16>
    %cst = arith.constant dense<0.000000e+00> : vector<16x128xf32>
    %6 = tpu.matmul %4, %5, %cst {dimension_numbers = #tpu.dot_dimension_numbers<[1], [0], [0], [1], [0, 0, 1, 1], [], []>} : vector<16x128xbf16>, vector<128x128xbf16>, vector<16x128xf32> -> vector<16x128xf32>
    %7 = arith.addf %3, %6 : vector<16x128xf32>
    %c0_6 = arith.constant 0 : index
    %c0_7 = arith.constant 0 : index
    %8 = vector.load %arg12[%c0_6, %c0_7] : memref<16x128xf32, #tpu.memory_space<vmem>>, vector<16x128xf32>
    tpu.vector_store %arg12[%c0_6, %c0_7], %7 {strides = array<i32>} : memref<16x128xf32, #tpu.memory_space<vmem>>, vector<16x128xf32>,
    %c0_i32_8 = arith.constant 0 : i32
    %9 = arith.cmpi eq, %arg1, %c0_i32_8 : i32
    %10 = arith.extui %9 : i1 to i32
    %c0_i32_9 = arith.constant 0 : i32
    %11 = arith.cmpi ne, %10, %c0_i32_9 : i32
    scf.if %11 {
      %c0_10 = arith.constant 0 : index
      %c0_11 = arith.constant 0 : index
      %12 = vector.load %arg12[%c0_10, %c0_11] : memref<16x128xf32, #tpu.memory_space<vmem>>, vector<16x128xf32>
      %c0_12 = arith.constant 0 : index
      %c0_13 = arith.constant 0 : index
      %13 = vector.load %arg4[%c0_12, %c0_13] : memref<1x128xf32, #tpu.memory_space<vmem>>, vector<1x128xf32>
      %14 = vector.broadcast %13 : vector<1x128xf32> to vector<16x128xf32>
      %15 = arith.addf %12, %14 : vector<16x128xf32>
      %cst_14 = arith.constant 0.000000e+00 : f32
      %16 = vector.broadcast %cst_14 : f32 to vector<16x128xf32>
      %17 = arith.cmpf ogt, %15, %16 : vector<16x128xf32>
      %cst_15 = arith.constant 2.000000e-01 : f32
      %18 = vector.broadcast %cst_15 : f32 to vector<16x128xf32>
      %19 = arith.mulf %18, %15 : vector<16x128xf32>
      %20 = arith.select %17, %15, %19 : vector<16x128xi1>, vector<16x128xf32>
      %21 = arith.truncf %20 : vector<16x128xf32> to vector<16x128xbf16>
      %c0_16 = arith.constant 0 : index
      %c0_17 = arith.constant 0 : index
      %22 = vector.load %arg5[%c0_16, %c0_17] : memref<128x128xbf16, #tpu.memory_space<vmem>>, vector<128x128xbf16>
      %cst_18 = arith.constant dense<0.000000e+00> : vector<16x128xf32>
      %23 = tpu.matmul %21, %22, %cst_18 {dimension_numbers = #tpu.dot_dimension_numbers<[1], [0], [0], [1], [0, 0, 1, 1], [], []>} : vector<16x128xbf16>, vector<128x128xbf16>, vector<16x128xf32> -> vector<16x128xf32>
      %c0_19 = arith.constant 0 : index
      %c0_20 = arith.constant 0 : index
      %24 = vector.load %arg6[%c0_19, %c0_20] : memref<1x128xf32, #tpu.memory_space<vmem>>, vector<1x128xf32>
      %25 = vector.broadcast %24 : vector<1x128xf32> to vector<16x128xf32>
      %26 = arith.addf %23, %25 : vector<16x128xf32>
      %cst_21 = arith.constant 0.000000e+00 : f32
      %27 = vector.broadcast %cst_21 : f32 to vector<16x128xf32>
      %28 = arith.cmpf ogt, %26, %27 : vector<16x128xf32>
      %cst_22 = arith.constant 2.000000e-01 : f32
      %29 = vector.broadcast %cst_22 : f32 to vector<16x128xf32>
      %30 = arith.mulf %29, %26 : vector<16x128xf32>
      %31 = arith.select %28, %26, %30 : vector<16x128xi1>, vector<16x128xf32>
      %32 = arith.truncf %31 : vector<16x128xf32> to vector<16x128xbf16>
      %c0_23 = arith.constant 0 : index
      %c0_24 = arith.constant 0 : index
      %33 = vector.load %arg7[%c0_23, %c0_24] : memref<128x128xbf16, #tpu.memory_space<vmem>>, vector<128x128xbf16>
      %cst_25 = arith.constant dense<0.000000e+00> : vector<16x128xf32>
      %34 = tpu.matmul %32, %33, %cst_25 {dimension_numbers = #tpu.dot_dimension_numbers<[1], [0], [0], [1], [0, 0, 1, 1], [], []>} : vector<16x128xbf16>, vector<128x128xbf16>, vector<16x128xf32> -> vector<16x128xf32>
      %c0_26 = arith.constant 0 : index
      %c0_27 = arith.constant 0 : index
      %35 = vector.load %arg8[%c0_26, %c0_27] : memref<1x128xf32, #tpu.memory_space<vmem>>, vector<1x128xf32>
      %36 = vector.broadcast %35 : vector<1x128xf32> to vector<16x128xf32>
      %37 = arith.addf %34, %36 : vector<16x128xf32>
      %cst_28 = arith.constant 0.000000e+00 : f32
      %38 = vector.broadcast %cst_28 : f32 to vector<16x128xf32>
      %39 = arith.cmpf ogt, %37, %38 : vector<16x128xf32>
      %cst_29 = arith.constant 2.000000e-01 : f32
      %40 = vector.broadcast %cst_29 : f32 to vector<16x128xf32>
      %41 = arith.mulf %40, %37 : vector<16x128xf32>
      %42 = arith.select %39, %37, %41 : vector<16x128xi1>, vector<16x128xf32>
      %43 = arith.truncf %42 : vector<16x128xf32> to vector<16x128xbf16>
      %c0_30 = arith.constant 0 : index
      %c0_31 = arith.constant 0 : index
      %44 = vector.load %arg9[%c0_30, %c0_31] : memref<128x128xbf16, #tpu.memory_space<vmem>>, vector<128x128xbf16>
      %cst_32 = arith.constant dense<0.000000e+00> : vector<16x128xf32>
      %45 = tpu.matmul %43, %44, %cst_32 {dimension_numbers = #tpu.dot_dimension_numbers<[1], [0], [0], [1], [0, 0, 1, 1], [], []>} : vector<16x128xbf16>, vector<128x128xbf16>, vector<16x128xf32> -> vector<16x128xf32>
      %c0_33 = arith.constant 0 : index
      %c0_34 = arith.constant 0 : index
      %46 = vector.load %arg10[%c0_33, %c0_34] : memref<1x128xf32, #tpu.memory_space<vmem>>, vector<1x128xf32>
      %47 = vector.broadcast %46 : vector<1x128xf32> to vector<16x128xf32>
      %48 = arith.addf %45, %47 : vector<16x128xf32>
      %c0_35 = arith.constant 0 : index
      %c0_36 = arith.constant 0 : index
      %49 = vector.load %arg11[%c0_35, %c0_36] : memref<16x128xf32, #tpu.memory_space<vmem>>, vector<16x128xf32>
      tpu.vector_store %arg11[%c0_35, %c0_36], %48 {strides = array<i32>} : memref<16x128xf32, #tpu.memory_space<vmem>>, vector<16x128xf32>,
    } else {
    }
    return
  }
  func.func @transform_0(%arg0: i32, %arg1: i32) -> (i32, i32) {
    %c0_i32 = arith.constant 0 : i32
    return %arg0, %arg1 : i32, i32
  }
  func.func @transform_1(%arg0: i32, %arg1: i32) -> (i32, i32) {
    %c0_i32 = arith.constant 0 : i32
    %c0_i32_0 = arith.constant 0 : i32
    return %arg1, %c0_i32 : i32, i32
  }
  func.func @transform_2(%arg0: i32, %arg1: i32) -> (i32, i32) {
    %c0_i32 = arith.constant 0 : i32
    %c0_i32_0 = arith.constant 0 : i32
    %c0_i32_1 = arith.constant 0 : i32
    return %c0_i32, %c0_i32_0 : i32, i32
  }
  func.func @transform_3(%arg0: i32, %arg1: i32) -> (i32, i32) {
    %c0_i32 = arith.constant 0 : i32
    %c0_i32_0 = arith.constant 0 : i32
    %c0_i32_1 = arith.constant 0 : i32
    return %c0_i32, %c0_i32_0 : i32, i32
  }
  func.func @transform_4(%arg0: i32, %arg1: i32) -> (i32, i32) {
    %c0_i32 = arith.constant 0 : i32
    %c0_i32_0 = arith.constant 0 : i32
    %c0_i32_1 = arith.constant 0 : i32
    return %c0_i32, %c0_i32_0 : i32, i32
  }
  func.func @transform_5(%arg0: i32, %arg1: i32) -> (i32, i32) {
    %c0_i32 = arith.constant 0 : i32
    %c0_i32_0 = arith.constant 0 : i32
    %c0_i32_1 = arith.constant 0 : i32
    return %c0_i32, %c0_i32_0 : i32, i32
  }
  func.func @transform_6(%arg0: i32, %arg1: i32) -> (i32, i32) {
    %c0_i32 = arith.constant 0 : i32
    %c0_i32_0 = arith.constant 0 : i32
    %c0_i32_1 = arith.constant 0 : i32
    return %c0_i32, %c0_i32_0 : i32, i32
  }
  func.func @transform_7(%arg0: i32, %arg1: i32) -> (i32, i32) {
    %c0_i32 = arith.constant 0 : i32
    %c0_i32_0 = arith.constant 0 : i32
    %c0_i32_1 = arith.constant 0 : i32
    return %c0_i32, %c0_i32_0 : i32, i32
  }
  func.func @transform_8(%arg0: i32, %arg1: i32) -> (i32, i32) {
    %c0_i32 = arith.constant 0 : i32
    %c0_i32_0 = arith.constant 0 : i32
    %c0_i32_1 = arith.constant 0 : i32
    return %c0_i32, %c0_i32_0 : i32, i32
  }
  func.func @transform_9(%arg0: i32, %arg1: i32) -> (i32, i32) {
    %c0_i32 = arith.constant 0 : i32
    %c0_i32_0 = arith.constant 0 : i32
    return %arg0, %c0_i32 : i32, i32
  }
}

</mosaic_0001>

<bundles_post_ra>
// kernel: tpu_custom_call.1
= control target key start
LH: loop header
LB: loop body
LE: loop exit
PB: predicated region body
PF: predicated region fallthrough
CT: control target
= control target key end

     0   :  { %14 = vsyncpa [#allocation4], 0  ;;  %s1092_s0 = inlined_call_operand.hbm [shape: bf16[16,128], index: 0, kind: input, shape index: {}]   ;;  %s1093_s1 = inlined_call_operand.hbm [shape: bf16[128,128], index: 1, kind: input, shape index: {}]   ;;  %s1094_s2 = inlined_call_operand.vmem [shape: f32[1,128], index: 2, kind: input, shape index: {}]   ;;  %s1095_s3 = inlined_call_operand.hbm [shape: bf16[128,128], index: 3, kind: input, shape index: {}]   ;;  %s1096_s4 = inlined_call_operand.vmem [shape: f32[1,128], index: 4, kind: input, shape index: {}]   ;;  %s1097_s5 = inlined_call_operand.hbm [shape: bf16[128,128], index: 5, kind: input, shape index: {}]   ;;  %s1098_s6 = inlined_call_operand.vmem [shape: f32[1,128], index: 6, kind: input, shape index: {}]   ;;  %s1099_s7 = inlined_call_operand.hbm [shape: bf16[128,128], index: 7, kind: input, shape index: {}]   ;;  %s1100_s8 = inlined_call_operand.vmem [shape: f32[1,128], index: 8, kind: input, shape index: {}]   ;;  %s1101_s9 = inlined_call_operand.hbm [shape: f32[16,128], index: 9, kind: output, shape index: {}]  }
   0x1   :  { %15 = vsyncpa [#allocation7], 0 }
   0x2   :  { %16 = vsyncpa [#allocation10], 0 }
   0x3   :  { %17 = vsyncpa [#allocation5], 0  ;;  %s945_s30 = smov [#allocation6]   ;;  %s946_s11 = smov [#allocation9]  }
   0x4   :  { %s35_s10 = sshll.u32 %s945_s30, 4  ;;  %s63_s12 = sshll.u32 %s946_s11, 4  ;;  %s36_s10 = int_to_ptr.vmem [resolvable:$true] %s35_s10  ;;  %s64_s12 = int_to_ptr.vmem [resolvable:$true] %s63_s12 }
   0x5   :  { %s825_s13 = scalar_lea.vmem %s36_s10, 1024  ;;  %p830_p1 = scmp.lt.s32.totalorder %s36_s10, %s36_s10 }
   0x6   :  { %p826_p0 = scmp.ne.s32.totalorder %s36_s10, %s825_s13  ;;  %p831_p2 = scmp.lt.s32.totalorder %s825_s13, %s825_s13 }
   0x8   :  { %p832_p3 = por %p831_p2, %p830_p1 }
   0xa   :  { %p833_p4 = pnand %p832_p3, %p826_p0 }
   0xc   :  { %836 = shalt.err (!%p833_p4)
}
   0xd   :  { %s947_s14 = smov 64   ;;  %s948_s15 = smov 4  }
   0xe   :  { %41 = dma.hbm_to_vmem [thread:$0]  %s1093_s1, 1024, %s36_s10, [#allocation7], %s947_s14, %s947_s14, %s948_s15  }
   0xf   :  { %s845_s18 = scalar_lea.vmem %s64_s12, 1024  ;;  %p850_p6 = scmp.lt.s32.totalorder %s64_s12, %s64_s12 }
  0x10   :  { %p846_p5 = scmp.ne.s32.totalorder %s64_s12, %s845_s18  ;;  %p851_p7 = scmp.lt.s32.totalorder %s845_s18, %s845_s18 }
  0x12   :  { %p852_p8 = por %p851_p7, %p850_p6 }
  0x14   :  { %p853_p9 = pnand %p852_p8, %p846_p5 }
  0x16   :  { %856 = shalt.err (!%p853_p9)
}
  0x17   :  { %69 = dma.hbm_to_vmem [thread:$0]  %s1097_s5, 1024, %s64_s12, [#allocation10], %s947_s14, %s947_s14, %s948_s15  }
  0x18   :  { %s949_s21 = smov [#allocation3]   ;;  %s950_s23 = smov [#allocation8]  }
  0x19   :  { %s23_s22 = sshll.u32 %s949_s21, 4  ;;  %s49_s24 = sshll.u32 %s950_s23, 4  ;;  %s24_s22 = int_to_ptr.vmem [resolvable:$true] %s23_s22  ;;  %s50_s24 = int_to_ptr.vmem [resolvable:$true] %s49_s24 }
  0x1a   :  { %s865_s1 = scalar_lea.vmem %s24_s22, 128  ;;  %p870_p11 = scmp.lt.s32.totalorder %s24_s22, %s24_s22 }
  0x1b   :  { %p866_p10 = scmp.ne.s32.totalorder %s24_s22, %s865_s1  ;;  %p871_p12 = scmp.lt.s32.totalorder %s865_s1, %s865_s1 }
  0x1d   :  { %p872_p13 = por %p871_p12, %p870_p11 }
  0x1f   :  { %p873_p0 = pnand %p872_p13, %p866_p10 }
  0x21   :  { %876 = shalt.err (!%p873_p0)
}
  0x22   :  { %29 = dma.hbm_to_vmem [thread:$0]  %s1092_s0, 128, %s24_s22, [#allocation4], %s947_s14, %s947_s14, %s948_s15  }
  0x23   :  { %s885_s5 = scalar_lea.vmem %s50_s24, 1024  ;;  %p890_p2 = scmp.lt.s32.totalorder %s50_s24, %s50_s24 }
  0x24   :  { %p886_p1 = scmp.ne.s32.totalorder %s50_s24, %s885_s5  ;;  %p891_p3 = scmp.lt.s32.totalorder %s885_s5, %s885_s5 }
  0x26   :  { %p892_p4 = por %p891_p3, %p890_p2 }
  0x28   :  { %p893_p5 = pnand %p892_p4, %p886_p1 }
  0x2a   :  { %896 = shalt.err (!%p893_p5)
}
  0x2b   :  { %55 = dma.hbm_to_vmem [thread:$0]  %s1095_s3, 1024, %s50_s24, [#allocation7], %s947_s14, %s947_s14, %s948_s15  }
  0x2c   :  { %s951_s29 = smov [#allocation11]  }
  0x2d   :  { %s77_s30 = sshll.u32 %s951_s29, 4  ;;  %s78_s30 = int_to_ptr.vmem [resolvable:$true] %s77_s30 }
  0x2e   :  { %s905_s10 = scalar_lea.vmem %s78_s30, 1024  ;;  %p910_p7 = scmp.lt.s32.totalorder %s78_s30, %s78_s30 }
  0x2f   :  { %p906_p6 = scmp.ne.s32.totalorder %s78_s30, %s905_s10  ;;  %p911_p8 = scmp.lt.s32.totalorder %s905_s10, %s905_s10 }
  0x31   :  { %p912_p9 = por %p911_p8, %p910_p7 }
  0x33   :  { %p913_p10 = pnand %p912_p9, %p906_p6 }
  0x35   :  { %916 = shalt.err (!%p913_p10)
}
  0x36   :  { %83 = dma.hbm_to_vmem [thread:$0]  %s1099_s7, 1024, %s78_s30, [#allocation10], %s947_s14, %s947_s14, %s948_s15  }
  0x37   :  { %937 = dma.done.wait [#allocation4], 128  }
  0x38   :  { %938 = vsyncadd [#allocation4], 4294967168 }
  0x39   :  { %939 = dma.done.wait [#allocation7], 2048  }
  0x3a   :  { %940 = vsyncadd [#allocation7], 4294965248 }
  0x3b   :  { %941 = dma.done.wait [#allocation10], 2048  }
  0x3c   :  { %942 = vsyncadd [#allocation10], 4294965248  ;;  %v952_v0 = vmov 0.0   ;;  %vm953_vm0 = vmmov 0   ;;  %v784_v1 = vld [vmem:[#allocation6 + $0x38] sm:$0xff]   ;;  %v785_v2 = vld [vmem:[#allocation6 + $0x30] sm:$0xff]  }
  0x3d   :  { %692 = vmatprep.subr.bf16.mxu0 %v952_v0  ;;  %708 = vmatprep.mubr.msk.bf16.mxu0 %vm953_vm0, %v952_v0  ;;  %v786_v3 = vld [vmem:[#allocation6 + $0x28] sm:$0xff]   ;;  %v793_v4 = vld [vmem:[#allocation8 + $0x38] sm:$0xff]   ;;  %v787_v5 = vld [vmem:[#allocation6 + $0x20] sm:$0xff]  }
  0x3e   :  { %712 = vmatprep.subr.bf16.mxu1 %v952_v0  ;;  %728 = vmatprep.mubr.msk.bf16.mxu1 %vm953_vm0, %v952_v0  ;;  %v794_v6 = vld [vmem:[#allocation8 + $0x30] sm:$0xff]   ;;  %v788_v7 = vld [vmem:[#allocation6 + $0x18] sm:$0xff]   ;;  %v795_v8 = vld [vmem:[#allocation8 + $0x28] sm:$0xff]  }
  0x3f   :  { %693 = vmatpush3.bf16.msra.mxu0 %v784_v1  ;;  %713 = vmatpush3.bf16.msra.mxu1 %v793_v4  ;;  %v789_v9 = vld [vmem:[#allocation6 + $0x10] sm:$0xff]   ;;  %v796_v10 = vld [vmem:[#allocation8 + $0x20] sm:$0xff]   ;;  %v790_v11 = vld [vmem:[#allocation6 + $0x8] sm:$0xff]  }
  0x40   :  { %694 = vmatprep.subr.bf16.mxu0 %v952_v0  ;;  %714 = vmatprep.subr.bf16.mxu1 %v952_v0  ;;  %v797_v12 = vld [vmem:[#allocation8 + $0x18] sm:$0xff]   ;;  %v791_v13 = vld [vmem:[#allocation6] sm:$0xff]   ;;  %v798_v15 = vld [vmem:[#allocation8 + $0x10] sm:$0xff]  }
  0x41   :  { %v792_v14 = vld [vmem:[#allocation3] sm:$0xff]   ;;  %v799_v16 = vld [vmem:[#allocation8 + $0x8] sm:$0xff]   ;;  %v800_v17 = vld [vmem:[#allocation8] sm:$0xff]  }
  0x42   :  { %v801_v18 = vld [vmem:[#allocation9 + $0x38] sm:$0xff]   ;;  %v802_v19 = vld [vmem:[#allocation9 + $0x30] sm:$0xff]   ;;  %v803_v20 = vld [vmem:[#allocation9 + $0x28] sm:$0xff]  }
  0x43   :  { %695 = vmatpush3.bf16.msra.mxu0 %v785_v2  ;;  %715 = vmatpush3.bf16.msra.mxu1 %v794_v6  ;;  %v804_v21 = vld [vmem:[#allocation9 + $0x20] sm:$0xff]   ;;  %v805_v22 = vld [vmem:[#allocation9 + $0x18] sm:$0xff]   ;;  %v806_v35 = vld [vmem:[#allocation9 + $0x10] sm:$0xff]  }
  0x44   :  { %696 = vmatprep.subr.bf16.mxu0 %v952_v0  ;;  %716 = vmatprep.subr.bf16.mxu1 %v952_v0  ;;  %v628_v23 = vld [vmem:[%s1094_s2] ss:$0 sm:$0xff]  ;;  %v807_v36 = vld [vmem:[#allocation9 + $0x8] sm:$0xff]   ;;  %v808_v37 = vld [vmem:[#allocation9] sm:$0xff]  }
  0x45   :  { %v809_v38 = vld [vmem:[#allocation11 + $0x38] sm:$0xff]   ;;  %v810_v39 = vld [vmem:[#allocation11 + $0x30] sm:$0xff]   ;;  %v811_v40 = vld [vmem:[#allocation11 + $0x28] sm:$0xff]  }
  0x46   :  { %v812_v41 = vld [vmem:[#allocation11 + $0x20] sm:$0xff]   ;;  %v813_v42 = vld [vmem:[#allocation11 + $0x18] sm:$0xff]   ;;  %v814_v55 = vld [vmem:[#allocation11 + $0x10] sm:$0xff]  }
  0x47   :  { %697 = vmatpush3.bf16.msra.mxu0 %v786_v3  ;;  %717 = vmatpush3.bf16.msra.mxu1 %v795_v8  ;;  %v629_v43 = vld [vmem:[%s1096_s4] ss:$0 sm:$0xff]  ;;  %v815_v56 = vld [vmem:[#allocation11 + $0x8] sm:$0xff]   ;;  %v816_v57 = vld [vmem:[#allocation11] sm:$0xff]  }
  0x48   :  { %698 = vmatprep.subr.bf16.mxu0 %v952_v0  ;;  %718 = vmatprep.subr.bf16.mxu1 %v952_v0  ;;  %v638_v58 = vld [vmem:[%s1098_s6] ss:$0 sm:$0xff]  ;;  %s954_s6 = smov [#allocation12]  }
  0x49   :  { %s605_s16 = sshll.u32 %s954_s6, 4  ;;  %s606_s16 = int_to_ptr.vmem [resolvable:$true] %s605_s16 }
  0x4a   :  { %s917_s17 = scalar_lea.vmem %s606_s16, 256  ;;  %p922_p12 = scmp.lt.s32.totalorder %s606_s16, %s606_s16 }
  0x4b   :  { %699 = vmatpush3.bf16.msra.mxu0 %v787_v5  ;;  %719 = vmatpush3.bf16.msra.mxu1 %v796_v10  ;;  %p918_p11 = scmp.ne.s32.totalorder %s606_s16, %s917_s17  ;;  %p923_p13 = scmp.lt.s32.totalorder %s917_s17, %s917_s17 }
  0x4c   :  { %700 = vmatprep.subr.bf16.mxu0 %v952_v0  ;;  %720 = vmatprep.subr.bf16.mxu1 %v952_v0 }
  0x4d   :  { %p924_p0 = por %p923_p13, %p922_p12 }
  0x4f   :  { %701 = vmatpush3.bf16.msra.mxu0 %v788_v7  ;;  %721 = vmatpush3.bf16.msra.mxu1 %v797_v12  ;;  %p925_p1 = pnand %p924_p0, %p918_p11 }
  0x50   :  { %702 = vmatprep.subr.bf16.mxu0 %v952_v0  ;;  %722 = vmatprep.subr.bf16.mxu1 %v952_v0 }
  0x53   :  { %703 = vmatpush3.bf16.msra.mxu0 %v789_v9  ;;  %723 = vmatpush3.bf16.msra.mxu1 %v798_v15 }
  0x54   :  { %704 = vmatprep.subr.bf16.mxu0 %v952_v0  ;;  %724 = vmatprep.subr.bf16.mxu1 %v952_v0 }
  0x57   :  { %705 = vmatpush3.bf16.msra.mxu0 %v790_v11  ;;  %725 = vmatpush3.bf16.msra.mxu1 %v799_v16 }
  0x58   :  { %706 = vmatprep.subr.bf16.mxu0 %v952_v0  ;;  %726 = vmatprep.subr.bf16.mxu1 %v952_v0 }
  0x5b   :  { %707 = vmatpush3.bf16.msra.mxu0 %v791_v13  ;;  %727 = vmatpush3.bf16.msra.mxu1 %v800_v17 }
  0x5c   :  { %732 = vmatprep.subr.bf16.mxu0 %v952_v0  ;;  %752 = vmatprep.subr.bf16.mxu1 %v952_v0 }
  0x5e   :  { %709 = vmatmul.mubr.bf16.vlgmr.msra.gmra.mxu0 %v792_v14 }
  0x5f   :  { %748 = vmatprep.mubr.msk.bf16.mxu0 %vm953_vm0, %v952_v0  ;;  %733 = vmatpush3.bf16.msra.mxu0 %v801_v18 }
  0x60   :  { %734 = vmatprep.subr.bf16.mxu0 %v952_v0 }
  0x63   :  { %735 = vmatpush3.bf16.msra.mxu0 %v802_v19 }
  0x64   :  { %736 = vmatprep.subr.bf16.mxu0 %v952_v0 }
  0x67   :  { %737 = vmatpush3.bf16.msra.mxu0 %v803_v20 }
  0x68   :  { %738 = vmatprep.subr.bf16.mxu0 %v952_v0 }
  0x6b   :  { %739 = vmatpush3.bf16.msra.mxu0 %v804_v21 }
  0x6c   :  { %740 = vmatprep.subr.bf16.mxu0 %v952_v0 }
  0x6f   :  { %741 = vmatpush3.bf16.msra.mxu0 %v805_v22 }
  0x70   :  { %742 = vmatprep.subr.bf16.mxu0 %v952_v0 }
  0x73   :  { %743 = vmatpush3.bf16.msra.mxu0 %v806_v35 }
  0x74   :  { %744 = vmatprep.subr.bf16.mxu0 %v952_v0 }
  0x77   :  { %745 = vmatpush3.bf16.msra.mxu0 %v807_v36 }
  0x78   :  { %746 = vmatprep.subr.bf16.mxu0 %v952_v0 }
  0x7b   :  { %747 = vmatpush3.bf16.msra.mxu0 %v808_v37 }
 0x11e   :  { %v216_v24 = vpop.f32.mrf.mxu0 }
 0x11f   :  { %v239_v25 = vadd.f32 %v628_v23, %v216_v24 }
 0x120   :  { %v710_v26 = vpop.f32.mrf.mxu0 }
 0x121   :  { %v243_v28 = vmul.f32 0.2, %v239_v25  ;;  %vm241_vm1 = vcmp.gt.f32.partialorder %v239_v25, 0.0 }
 0x122   :  { %v219_v27 = vpop.f32.mrf.mxu0 }
 0x123   :  { %v240_v29 = vadd.f32 %v628_v23, %v219_v27  ;;  %v245_v32 = vsel %vm241_vm1, %v239_v25, %v243_v28 }
 0x124   :  { %v711_v30 = vpop.f32.mrf.mxu0 }
 0x125   :  { %vm242_vm2 = vcmp.gt.f32.partialorder %v240_v29, 0.0  ;;  %v244_v31 = vmul.f32 0.2, %v240_v29 }
 0x127   :  { %v246_v33 = vsel %vm242_vm2, %v240_v29, %v244_v31 }
 0x128   :  { %v247_v34 = vpack.c.bf16 %v246_v33, %v245_v32 }
 0x12a   :  { %729 = vmatmul.mubr.bf16.vlgmr.msra.gmra.mxu1 %v247_v34 }
 0x12b   :  { %768 = vmatprep.mubr.msk.bf16.mxu1 %vm953_vm0, %v952_v0  ;;  %753 = vmatpush3.bf16.msra.mxu1 %v809_v38 }
 0x12c   :  { %754 = vmatprep.subr.bf16.mxu1 %v952_v0 }
 0x12f   :  { %755 = vmatpush3.bf16.msra.mxu1 %v810_v39 }
 0x130   :  { %756 = vmatprep.subr.bf16.mxu1 %v952_v0 }
 0x133   :  { %757 = vmatpush3.bf16.msra.mxu1 %v811_v40 }
 0x134   :  { %758 = vmatprep.subr.bf16.mxu1 %v952_v0 }
 0x137   :  { %759 = vmatpush3.bf16.msra.mxu1 %v812_v41 }
 0x138   :  { %760 = vmatprep.subr.bf16.mxu1 %v952_v0 }
 0x13b   :  { %761 = vmatpush3.bf16.msra.mxu1 %v813_v42 }
 0x13c   :  { %762 = vmatprep.subr.bf16.mxu1 %v952_v0 }
 0x13f   :  { %763 = vmatpush3.bf16.msra.mxu1 %v814_v55 }
 0x140   :  { %764 = vmatprep.subr.bf16.mxu1 %v952_v0 }
 0x143   :  { %765 = vmatpush3.bf16.msra.mxu1 %v815_v56 }
 0x144   :  { %766 = vmatprep.subr.bf16.mxu1 %v952_v0  ;;  %v647_v0 = vld [vmem:[%s1100_s8] ss:$0 sm:$0xff] }
 0x147   :  { %767 = vmatpush3.bf16.msra.mxu1 %v816_v57 }
 0x1ea   :  { %v353_v44 = vpop.f32.mrf.mxu1 }
 0x1eb   :  { %v354_v45 = vadd.f32 %v629_v43, %v353_v44 }
 0x1ec   :  { %v730_v46 = vpop.f32.mrf.mxu1 }
 0x1ed   :  { %v362_v48 = vmul.f32 0.2, %v354_v45  ;;  %vm360_vm3 = vcmp.gt.f32.partialorder %v354_v45, 0.0 }
 0x1ee   :  { %v356_v47 = vpop.f32.mrf.mxu1 }
 0x1ef   :  { %v357_v49 = vadd.f32 %v629_v43, %v356_v47  ;;  %v364_v52 = vsel %vm360_vm3, %v354_v45, %v362_v48 }
 0x1f0   :  { %v731_v50 = vpop.f32.mrf.mxu1 }
 0x1f1   :  { %vm361_vm4 = vcmp.gt.f32.partialorder %v357_v49, 0.0  ;;  %v363_v51 = vmul.f32 0.2, %v357_v49 }
 0x1f3   :  { %v365_v53 = vsel %vm361_vm4, %v357_v49, %v363_v51 }
 0x1f4   :  { %v366_v54 = vpack.c.bf16 %v365_v53, %v364_v52 }
 0x1f6   :  { %749 = vmatmul.mubr.bf16.vlgmr.msra.gmra.mxu0 %v366_v54 }
 0x2b6   :  { %v472_v59 = vpop.f32.mrf.mxu0 }
 0x2b7   :  { %v473_v60 = vadd.f32 %v638_v58, %v472_v59 }
 0x2b8   :  { %v750_v61 = vpop.f32.mrf.mxu0 }
 0x2b9   :  { %v481_v63 = vmul.f32 0.2, %v473_v60  ;;  %vm479_vm5 = vcmp.gt.f32.partialorder %v473_v60, 0.0 }
 0x2ba   :  { %v475_v62 = vpop.f32.mrf.mxu0 }
 0x2bb   :  { %v476_v1 = vadd.f32 %v638_v58, %v475_v62  ;;  %v483_v4 = vsel %vm479_vm5, %v473_v60, %v481_v63 }
 0x2bc   :  { %v751_v2 = vpop.f32.mrf.mxu0 }
 0x2bd   :  { %vm480_vm6 = vcmp.gt.f32.partialorder %v476_v1, 0.0  ;;  %v482_v3 = vmul.f32 0.2, %v476_v1 }
 0x2bf   :  { %v484_v5 = vsel %vm480_vm6, %v476_v1, %v482_v3 }
 0x2c0   :  { %v485_v6 = vpack.c.bf16 %v484_v5, %v483_v4 }
 0x2c2   :  { %769 = vmatmul.mubr.bf16.vlgmr.msra.gmra.mxu1 %v485_v6 }
 0x382   :  { %v591_v7 = vpop.f32.mrf.mxu1 }
 0x383   :  { %v592_v8 = vadd.f32 %v647_v0, %v591_v7 }
 0x384   :  { %v770_v9 = vpop.f32.mrf.mxu1 }
 0x385   :  { %598 = vst [vmem:[#allocation12] sm:$0xff] %v592_v8 }
 0x386   :  { %v594_v10 = vpop.f32.mrf.mxu1 }
 0x387   :  { %v595_v11 = vadd.f32 %v647_v0, %v594_v10 }
 0x388   :  { %v771_v12 = vpop.f32.mrf.mxu1 }
 0x389   :  { %599 = vst [vmem:[#allocation12 + $0x8] sm:$0xff] %v595_v11 }
 0x38a   :  { %928 = shalt.err (!%p925_p1)
}
 0x38b   :  { %s955_s18 = smov 128   ;;  %s956_s8 = smov 8  }
 0x38c   :  { %611 = dma.vmem_to_hbm [thread:$0]  %s606_s16, 256, %s1101_s9, [#allocation5], %s955_s18, %s955_s18, %s956_s8  }
 0x38d   :  { %943 = dma.done.wait [#allocation5], 256  }
 0x38e   :  { %944 = vsyncadd [#allocation5], 4294967040 }
 0x38f   :  { %615 = vsyncpa [#allocation4], 1 }
 0x390   :  { %616 = vsyncpa [#allocation7], 1 }
 0x391   :  { %617 = vsyncpa [#allocation10], 1 }
 0x392   :  { %618 = vsyncpa [#allocation5], 1 }

</bundles_post_ra>
